<compile_context>
chip_gen: v7x
topology: tpu7x:2x2x1
jax: 0.10.0
libtpu: 0.0.40
codegen_flags: <defaults>
</compile_context>

<pallas_src>
import functools

import jax
import jax.numpy as jnp
import numpy as np
from jax.experimental import pallas as pl
from jax.experimental.pallas import tpu as pltpu


def _bert_embeddings_kernel(ids_ref,                      # scalar prefetch (SMEM)
                            wemb_ref,                     # (V, H) f32, HBM (pl.ANY)
                            pos_ref,                      # (TS, H) bf16 block
                            type_ref,                     # (TV, H) bf16 block
                            tt_oh_ref,                    # (1, TS, TV) bf16 block
                            lnw_ref, lnb_ref,             # (1, H) f32
                            out_ref,                      # (1, TS, H) f32
                            wrow_scr, dma_sem,            # scratch
                            *, ts, seq_len, eps):
    b = pl.program_id(0)
    j = pl.program_id(1)
    base = b * seq_len + j * ts

    # --- word embedding gather: one row DMA per token (ids come from SMEM) ---
    for t in range(ts):
        tok = ids_ref[base + t]
        pltpu.make_async_copy(wemb_ref.at[tok], wrow_scr.at[t], dma_sem.at[0]).start()

    # --- token-type embedding: one-hot @ table (bf16 MXU, f32 accumulate) ---
    tt_emb = jnp.dot(tt_oh_ref[0], type_ref[...],
                     preferred_element_type=jnp.float32)          # (TS, H) f32
    pos_emb = pos_ref[...].astype(jnp.float32)                    # (TS, H) f32

    # --- wait for all gather DMAs ---
    for _ in range(ts):
        pltpu.make_async_copy(wemb_ref.at[0], wrow_scr.at[0], dma_sem.at[0]).wait()

    emb = wrow_scr[...].astype(jnp.float32) + pos_emb + tt_emb    # (TS, H) f32

    # --- BertLayerNorm: biased variance over last dim, eps inside sqrt, f32 math ---
    mu = jnp.mean(emb, axis=-1, keepdims=True)
    var = jnp.mean((emb - mu) ** 2, axis=-1, keepdims=True)
    normed = (emb - mu) * jax.lax.rsqrt(var + eps)
    out = normed * lnw_ref[...] + lnb_ref[...]

    # dropout == identity (inference)
    out_ref[...] = out.reshape(1, ts, out.shape[-1]).astype(out_ref.dtype)


def bert_embeddings_pallas(input_ids, token_type_ids, params,
                           *, seq_block=None, eps=1e-12):
    B, S = input_ids.shape
    V, H = params["word_embeddings"].shape
    TV = params["token_type_embeddings"].shape[0]

    if token_type_ids is None:
        token_type_ids = jnp.zeros_like(input_ids)

    if seq_block is None:
        seq_block = S if S <= 128 else 128
    TS = seq_block
    assert S % TS == 0, "seq_block must divide the sequence length"

    ids_flat = input_ids.reshape(-1).astype(jnp.int32)
    # Tiny (B, S, TV) one-hot for the 2-row token-type table; exact in bf16.
    tt_onehot = (token_type_ids[..., None] ==
                 jnp.arange(TV, dtype=jnp.int32)).astype(
                     params["token_type_embeddings"].dtype)

    lnw = params["ln_weight"].astype(jnp.float32).reshape(1, H)
    lnb = params["ln_bias"].astype(jnp.float32).reshape(1, H)

    kernel = functools.partial(_bert_embeddings_kernel, ts=TS, seq_len=S, eps=eps)

    grid_spec = pltpu.PrefetchScalarGridSpec(
        num_scalar_prefetch=1,                               # token ids -> SMEM
        grid=(B, S // TS),
        in_specs=[
            pl.BlockSpec(memory_space=pl.ANY),                        # word table (HBM)
            pl.BlockSpec((TS, H), lambda b, j, ids: (j, 0)),          # position rows
            pl.BlockSpec((TV, H), lambda b, j, ids: (0, 0)),          # token-type table
            pl.BlockSpec((1, TS, TV), lambda b, j, ids: (b, j, 0)),   # token-type one-hot
            pl.BlockSpec((1, H), lambda b, j, ids: (0, 0)),           # LN weight
            pl.BlockSpec((1, H), lambda b, j, ids: (0, 0)),           # LN bias
        ],
        out_specs=pl.BlockSpec((1, TS, H), lambda b, j, ids: (b, j, 0)),
        scratch_shapes=[
            pltpu.VMEM((TS, H), params["word_embeddings"].dtype),     # gathered rows
            pltpu.SemaphoreType.DMA((1,)),
        ],
    )

    return pl.pallas_call(
        kernel,
        out_shape=jax.ShapeDtypeStruct((B, S, H), jnp.float32),
        grid_spec=grid_spec,
        compiler_params=pltpu.CompilerParams(
            # batch and sequence blocks are fully independent -> megacore on v7x
            dimension_semantics=("parallel", "parallel"),
            # explicit scoped-VMEM budget (per-step footprint is a few hundred KB
            # even at BERT-base shapes; 32 MiB leaves ample double-buffer headroom)
            vmem_limit_bytes=32 * 1024 * 1024,
        ),
    )(ids_flat,
      params["word_embeddings"],
      params["position_embeddings"],
      params["token_type_embeddings"],
      tt_onehot, lnw, lnb)


def bert_embeddings_ref(input_ids, token_type_ids, params, eps=1e-12):
    """Pure-JAX reference replicating the torch forward (dropout = identity)."""
    B, S = input_ids.shape
    if token_type_ids is None:
        token_type_ids = jnp.zeros_like(input_ids)
    w = params["word_embeddings"].astype(jnp.float32)[input_ids]
    p = params["position_embeddings"].astype(jnp.float32)[jnp.arange(S)][None, :, :]
    t = params["token_type_embeddings"].astype(jnp.float32)[token_type_ids]
    emb = w + p + t
    mu = jnp.mean(emb, axis=-1, keepdims=True)
    var = jnp.mean((emb - mu) ** 2, axis=-1, keepdims=True)
    normed = (emb - mu) / jnp.sqrt(var + eps)
    return normed * params["ln_weight"].astype(jnp.float32) + params["ln_bias"].astype(jnp.float32)


if __name__ == "__main__":
    # Small shapes consistent with the module's structure.
    B, S, H = 2, 8, 32          # batch, seq, hidden
    V, P, TV = 64, 64, 2        # vocab, max positions, type vocab

    key = jax.random.PRNGKey(0)
    k0, k1, k2, k3, k4, k5 = jax.random.split(key, 6)
    std = 0.02                  # initializer_range

    params = {
        "word_embeddings": std * jax.random.normal(k0, (V, H), jnp.float32),
        "position_embeddings": (std * jax.random.normal(k1, (P, H), jnp.float32)
                                ).astype(jnp.bfloat16),
        "token_type_embeddings": (std * jax.random.normal(k2, (TV, H), jnp.float32)
                                  ).astype(jnp.bfloat16),
        "ln_weight": 1.0 + 0.1 * jax.random.normal(k3, (H,), jnp.float32),
        "ln_bias": 0.1 * jax.random.normal(k4, (H,), jnp.float32),
    }

    input_ids = jax.random.randint(k5, (B, S), 0, V, dtype=jnp.int32)
    token_type_ids = jnp.concatenate(
        [jnp.zeros((B, S // 2), jnp.int32), jnp.ones((B, S // 2), jnp.int32)], axis=1)

    out = bert_embeddings_pallas(input_ids, token_type_ids, params)
    out = jax.block_until_ready(out)

    ref = bert_embeddings_ref(input_ids, token_type_ids, params)
    np.testing.assert_allclose(np.asarray(out), np.asarray(ref), atol=1e-4, rtol=1e-4)

    print("KERNEL_OK")
</pallas_src>

<mosaic_0001>
module attributes {stable_mosaic.version = 11 : i64} {
  func.func @_bert_embeddings_kernel(%arg0: i32, %arg1: i32, %arg2: memref<16xi32, #tpu.memory_space<smem>>, %arg3: memref<64x32xf32, #tpu.memory_space<any>>, %arg4: memref<8x32xbf16, #tpu.memory_space<vmem>>, %arg5: memref<2x32xbf16, #tpu.memory_space<vmem>>, %arg6: memref<1x8x2xbf16, #tpu.memory_space<vmem>>, %arg7: memref<1x32xf32, #tpu.memory_space<vmem>>, %arg8: memref<1x32xf32, #tpu.memory_space<vmem>>, %arg9: memref<1x8x32xf32, #tpu.memory_space<vmem>>, %arg10: memref<8x32xf32, #tpu.memory_space<vmem>>, %arg11: memref<1x!tpu.dma_semaphore, #tpu.memory_space<semaphore_mem>>) attributes {dimension_semantics = [#tpu.dimension_semantics<parallel>, #tpu.dimension_semantics<parallel>], iteration_bounds = array<i64: 2, 1>, scalar_prefetch = 1 : i64, scratch_operands = 2 : i64, tpu.core_type = #tpu.core_type<tc>, window_params = [{}, {transform_indices = @transform_1, window_bounds = array<i64: 8, 32>}, {pipeline_mode = #tpu.pipeline_mode<synchronous>, transform_indices = @transform_2, window_bounds = array<i64: 2, 32>}, {transform_indices = @transform_3, window_bounds = array<i64: 1, 8, 2>}, {pipeline_mode = #tpu.pipeline_mode<synchronous>, transform_indices = @transform_4, window_bounds = array<i64: 1, 32>}, {pipeline_mode = #tpu.pipeline_mode<synchronous>, transform_indices = @transform_5, window_bounds = array<i64: 1, 32>}, {transform_indices = @transform_6, window_bounds = array<i64: 1, 8, 32>}]} {
    %c8_i32 = arith.constant 8 : i32
    %0 = arith.muli %arg0, %c8_i32 : i32
    %c8_i32_0 = arith.constant 8 : i32
    %1 = arith.muli %arg1, %c8_i32_0 : i32
    %2 = arith.addi %0, %1 : i32
    %c0_i32 = arith.constant 0 : i32
    %3 = arith.addi %2, %c0_i32 : i32
    %4 = arith.index_cast %3 : i32 to index
    %5 = memref.load %arg2[%4] : memref<16xi32, #tpu.memory_space<smem>>
    %c0_i32_1 = arith.constant 0 : i32
    %c0_i32_2 = arith.constant 0 : i32
    %c0_i32_3 = arith.constant 0 : i32
    %6 = tpu.memref_slice %arg3[%5, %c0_i32_3] : memref<64x32xf32, #tpu.memory_space<any>> -> memref<1x32xf32, #tpu.memory_space<any>>
    %7 = tpu.memref_squeeze %6 : memref<1x32xf32, #tpu.memory_space<any>> -> memref<32xf32, #tpu.memory_space<any>>
    %c0_i32_4 = arith.constant 0 : i32
    %8 = tpu.memref_slice %arg10[%c0_i32_1, %c0_i32_4] : memref<8x32xf32, #tpu.memory_space<vmem>> -> memref<1x32xf32, #tpu.memory_space<vmem>>
    %9 = tpu.memref_squeeze %8 : memref<1x32xf32, #tpu.memory_space<vmem>> -> memref<32xf32, #tpu.memory_space<vmem>>
    %10 = tpu.memref_slice %arg11[%c0_i32_2] : memref<1x!tpu.dma_semaphore, #tpu.memory_space<semaphore_mem>> -> memref<1x!tpu.dma_semaphore, #tpu.memory_space<semaphore_mem>>
    %11 = tpu.memref_squeeze %10 : memref<1x!tpu.dma_semaphore, #tpu.memory_space<semaphore_mem>> -> memref<!tpu.dma_semaphore, #tpu.memory_space<semaphore_mem>>
    tpu.enqueue_dma source(%7 : memref<32xf32, #tpu.memory_space<any>>) target(%9 : memref<32xf32, #tpu.memory_space<vmem>>) target_semaphore(%11 : memref<!tpu.dma_semaphore, #tpu.memory_space<semaphore_mem>>)
    %c1_i32 = arith.constant 1 : i32
    %12 = arith.addi %2, %c1_i32 : i32
    %13 = arith.index_cast %12 : i32 to index
    %14 = memref.load %arg2[%13] : memref<16xi32, #tpu.memory_space<smem>>
    %c1_i32_5 = arith.constant 1 : i32
    %c0_i32_6 = arith.constant 0 : i32
    %c0_i32_7 = arith.constant 0 : i32
    %15 = tpu.memref_slice %arg3[%14, %c0_i32_7] : memref<64x32xf32, #tpu.memory_space<any>> -> memref<1x32xf32, #tpu.memory_space<any>>
    %16 = tpu.memref_squeeze %15 : memref<1x32xf32, #tpu.memory_space<any>> -> memref<32xf32, #tpu.memory_space<any>>
    %c0_i32_8 = arith.constant 0 : i32
    %17 = tpu.memref_slice %arg10[%c1_i32_5, %c0_i32_8] : memref<8x32xf32, #tpu.memory_space<vmem>> -> memref<1x32xf32, #tpu.memory_space<vmem>>
    %18 = tpu.memref_squeeze %17 : memref<1x32xf32, #tpu.memory_space<vmem>> -> memref<32xf32, #tpu.memory_space<vmem>>
    %19 = tpu.memref_slice %arg11[%c0_i32_6] : memref<1x!tpu.dma_semaphore, #tpu.memory_space<semaphore_mem>> -> memref<1x!tpu.dma_semaphore, #tpu.memory_space<semaphore_mem>>
    %20 = tpu.memref_squeeze %19 : memref<1x!tpu.dma_semaphore, #tpu.memory_space<semaphore_mem>> -> memref<!tpu.dma_semaphore, #tpu.memory_space<semaphore_mem>>
    tpu.enqueue_dma source(%16 : memref<32xf32, #tpu.memory_space<any>>) target(%18 : memref<32xf32, #tpu.memory_space<vmem>>) target_semaphore(%20 : memref<!tpu.dma_semaphore, #tpu.memory_space<semaphore_mem>>)
    %c2_i32 = arith.constant 2 : i32
    %21 = arith.addi %2, %c2_i32 : i32
    %22 = arith.index_cast %21 : i32 to index
    %23 = memref.load %arg2[%22] : memref<16xi32, #tpu.memory_space<smem>>
    %c2_i32_9 = arith.constant 2 : i32
    %c0_i32_10 = arith.constant 0 : i32
    %c0_i32_11 = arith.constant 0 : i32
    %24 = tpu.memref_slice %arg3[%23, %c0_i32_11] : memref<64x32xf32, #tpu.memory_space<any>> -> memref<1x32xf32, #tpu.memory_space<any>>
    %25 = tpu.memref_squeeze %24 : memref<1x32xf32, #tpu.memory_space<any>> -> memref<32xf32, #tpu.memory_space<any>>
    %c0_i32_12 = arith.constant 0 : i32
    %26 = tpu.memref_slice %arg10[%c2_i32_9, %c0_i32_12] : memref<8x32xf32, #tpu.memory_space<vmem>> -> memref<1x32xf32, #tpu.memory_space<vmem>>
    %27 = tpu.memref_squeeze %26 : memref<1x32xf32, #tpu.memory_space<vmem>> -> memref<32xf32, #tpu.memory_space<vmem>>
    %28 = tpu.memref_slice %arg11[%c0_i32_10] : memref<1x!tpu.dma_semaphore, #tpu.memory_space<semaphore_mem>> -> memref<1x!tpu.dma_semaphore, #tpu.memory_space<semaphore_mem>>
    %29 = tpu.memref_squeeze %28 : memref<1x!tpu.dma_semaphore, #tpu.memory_space<semaphore_mem>> -> memref<!tpu.dma_semaphore, #tpu.memory_space<semaphore_mem>>
    tpu.enqueue_dma source(%25 : memref<32xf32, #tpu.memory_space<any>>) target(%27 : memref<32xf32, #tpu.memory_space<vmem>>) target_semaphore(%29 : memref<!tpu.dma_semaphore, #tpu.memory_space<semaphore_mem>>)
    %c3_i32 = arith.constant 3 : i32
    %30 = arith.addi %2, %c3_i32 : i32
    %31 = arith.index_cast %30 : i32 to index
    %32 = memref.load %arg2[%31] : memref<16xi32, #tpu.memory_space<smem>>
    %c3_i32_13 = arith.constant 3 : i32
    %c0_i32_14 = arith.constant 0 : i32
    %c0_i32_15 = arith.constant 0 : i32
    %33 = tpu.memref_slice %arg3[%32, %c0_i32_15] : memref<64x32xf32, #tpu.memory_space<any>> -> memref<1x32xf32, #tpu.memory_space<any>>
    %34 = tpu.memref_squeeze %33 : memref<1x32xf32, #tpu.memory_space<any>> -> memref<32xf32, #tpu.memory_space<any>>
    %c0_i32_16 = arith.constant 0 : i32
    %35 = tpu.memref_slice %arg10[%c3_i32_13, %c0_i32_16] : memref<8x32xf32, #tpu.memory_space<vmem>> -> memref<1x32xf32, #tpu.memory_space<vmem>>
    %36 = tpu.memref_squeeze %35 : memref<1x32xf32, #tpu.memory_space<vmem>> -> memref<32xf32, #tpu.memory_space<vmem>>
    %37 = tpu.memref_slice %arg11[%c0_i32_14] : memref<1x!tpu.dma_semaphore, #tpu.memory_space<semaphore_mem>> -> memref<1x!tpu.dma_semaphore, #tpu.memory_space<semaphore_mem>>
    %38 = tpu.memref_squeeze %37 : memref<1x!tpu.dma_semaphore, #tpu.memory_space<semaphore_mem>> -> memref<!tpu.dma_semaphore, #tpu.memory_space<semaphore_mem>>
    tpu.enqueue_dma source(%34 : memref<32xf32, #tpu.memory_space<any>>) target(%36 : memref<32xf32, #tpu.memory_space<vmem>>) target_semaphore(%38 : memref<!tpu.dma_semaphore, #tpu.memory_space<semaphore_mem>>)
    %c4_i32 = arith.constant 4 : i32
    %39 = arith.addi %2, %c4_i32 : i32
    %40 = arith.index_cast %39 : i32 to index
    %41 = memref.load %arg2[%40] : memref<16xi32, #tpu.memory_space<smem>>
    %c4_i32_17 = arith.constant 4 : i32
    %c0_i32_18 = arith.constant 0 : i32
    %c0_i32_19 = arith.constant 0 : i32
    %42 = tpu.memref_slice %arg3[%41, %c0_i32_19] : memref<64x32xf32, #tpu.memory_space<any>> -> memref<1x32xf32, #tpu.memory_space<any>>
    %43 = tpu.memref_squeeze %42 : memref<1x32xf32, #tpu.memory_space<any>> -> memref<32xf32, #tpu.memory_space<any>>
    %c0_i32_20 = arith.constant 0 : i32
    %44 = tpu.memref_slice %arg10[%c4_i32_17, %c0_i32_20] : memref<8x32xf32, #tpu.memory_space<vmem>> -> memref<1x32xf32, #tpu.memory_space<vmem>>
    %45 = tpu.memref_squeeze %44 : memref<1x32xf32, #tpu.memory_space<vmem>> -> memref<32xf32, #tpu.memory_space<vmem>>
    %46 = tpu.memref_slice %arg11[%c0_i32_18] : memref<1x!tpu.dma_semaphore, #tpu.memory_space<semaphore_mem>> -> memref<1x!tpu.dma_semaphore, #tpu.memory_space<semaphore_mem>>
    %47 = tpu.memref_squeeze %46 : memref<1x!tpu.dma_semaphore, #tpu.memory_space<semaphore_mem>> -> memref<!tpu.dma_semaphore, #tpu.memory_space<semaphore_mem>>
    tpu.enqueue_dma source(%43 : memref<32xf32, #tpu.memory_space<any>>) target(%45 : memref<32xf32, #tpu.memory_space<vmem>>) target_semaphore(%47 : memref<!tpu.dma_semaphore, #tpu.memory_space<semaphore_mem>>)
    %c5_i32 = arith.constant 5 : i32
    %48 = arith.addi %2, %c5_i32 : i32
    %49 = arith.index_cast %48 : i32 to index
    %50 = memref.load %arg2[%49] : memref<16xi32, #tpu.memory_space<smem>>
    %c5_i32_21 = arith.constant 5 : i32
    %c0_i32_22 = arith.constant 0 : i32
    %c0_i32_23 = arith.constant 0 : i32
    %51 = tpu.memref_slice %arg3[%50, %c0_i32_23] : memref<64x32xf32, #tpu.memory_space<any>> -> memref<1x32xf32, #tpu.memory_space<any>>
    %52 = tpu.memref_squeeze %51 : memref<1x32xf32, #tpu.memory_space<any>> -> memref<32xf32, #tpu.memory_space<any>>
    %c0_i32_24 = arith.constant 0 : i32
    %53 = tpu.memref_slice %arg10[%c5_i32_21, %c0_i32_24] : memref<8x32xf32, #tpu.memory_space<vmem>> -> memref<1x32xf32, #tpu.memory_space<vmem>>
    %54 = tpu.memref_squeeze %53 : memref<1x32xf32, #tpu.memory_space<vmem>> -> memref<32xf32, #tpu.memory_space<vmem>>
    %55 = tpu.memref_slice %arg11[%c0_i32_22] : memref<1x!tpu.dma_semaphore, #tpu.memory_space<semaphore_mem>> -> memref<1x!tpu.dma_semaphore, #tpu.memory_space<semaphore_mem>>
    %56 = tpu.memref_squeeze %55 : memref<1x!tpu.dma_semaphore, #tpu.memory_space<semaphore_mem>> -> memref<!tpu.dma_semaphore, #tpu.memory_space<semaphore_mem>>
    tpu.enqueue_dma source(%52 : memref<32xf32, #tpu.memory_space<any>>) target(%54 : memref<32xf32, #tpu.memory_space<vmem>>) target_semaphore(%56 : memref<!tpu.dma_semaphore, #tpu.memory_space<semaphore_mem>>)
    %c6_i32 = arith.constant 6 : i32
    %57 = arith.addi %2, %c6_i32 : i32
    %58 = arith.index_cast %57 : i32 to index
    %59 = memref.load %arg2[%58] : memref<16xi32, #tpu.memory_space<smem>>
    %c6_i32_25 = arith.constant 6 : i32
    %c0_i32_26 = arith.constant 0 : i32
    %c0_i32_27 = arith.constant 0 : i32
    %60 = tpu.memref_slice %arg3[%59, %c0_i32_27] : memref<64x32xf32, #tpu.memory_space<any>> -> memref<1x32xf32, #tpu.memory_space<any>>
    %61 = tpu.memref_squeeze %60 : memref<1x32xf32, #tpu.memory_space<any>> -> memref<32xf32, #tpu.memory_space<any>>
    %c0_i32_28 = arith.constant 0 : i32
    %62 = tpu.memref_slice %arg10[%c6_i32_25, %c0_i32_28] : memref<8x32xf32, #tpu.memory_space<vmem>> -> memref<1x32xf32, #tpu.memory_space<vmem>>
    %63 = tpu.memref_squeeze %62 : memref<1x32xf32, #tpu.memory_space<vmem>> -> memref<32xf32, #tpu.memory_space<vmem>>
    %64 = tpu.memref_slice %arg11[%c0_i32_26] : memref<1x!tpu.dma_semaphore, #tpu.memory_space<semaphore_mem>> -> memref<1x!tpu.dma_semaphore, #tpu.memory_space<semaphore_mem>>
    %65 = tpu.memref_squeeze %64 : memref<1x!tpu.dma_semaphore, #tpu.memory_space<semaphore_mem>> -> memref<!tpu.dma_semaphore, #tpu.memory_space<semaphore_mem>>
    tpu.enqueue_dma source(%61 : memref<32xf32, #tpu.memory_space<any>>) target(%63 : memref<32xf32, #tpu.memory_space<vmem>>) target_semaphore(%65 : memref<!tpu.dma_semaphore, #tpu.memory_space<semaphore_mem>>)
    %c7_i32 = arith.constant 7 : i32
    %66 = arith.addi %2, %c7_i32 : i32
    %67 = arith.index_cast %66 : i32 to index
    %68 = memref.load %arg2[%67] : memref<16xi32, #tpu.memory_space<smem>>
    %c7_i32_29 = arith.constant 7 : i32
    %c0_i32_30 = arith.constant 0 : i32
    %c0_i32_31 = arith.constant 0 : i32
    %69 = tpu.memref_slice %arg3[%68, %c0_i32_31] : memref<64x32xf32, #tpu.memory_space<any>> -> memref<1x32xf32, #tpu.memory_space<any>>
    %70 = tpu.memref_squeeze %69 : memref<1x32xf32, #tpu.memory_space<any>> -> memref<32xf32, #tpu.memory_space<any>>
    %c0_i32_32 = arith.constant 0 : i32
    %71 = tpu.memref_slice %arg10[%c7_i32_29, %c0_i32_32] : memref<8x32xf32, #tpu.memory_space<vmem>> -> memref<1x32xf32, #tpu.memory_space<vmem>>
    %72 = tpu.memref_squeeze %71 : memref<1x32xf32, #tpu.memory_space<vmem>> -> memref<32xf32, #tpu.memory_space<vmem>>
    %73 = tpu.memref_slice %arg11[%c0_i32_30] : memref<1x!tpu.dma_semaphore, #tpu.memory_space<semaphore_mem>> -> memref<1x!tpu.dma_semaphore, #tpu.memory_space<semaphore_mem>>
    %74 = tpu.memref_squeeze %73 : memref<1x!tpu.dma_semaphore, #tpu.memory_space<semaphore_mem>> -> memref<!tpu.dma_semaphore, #tpu.memory_space<semaphore_mem>>
    tpu.enqueue_dma source(%70 : memref<32xf32, #tpu.memory_space<any>>) target(%72 : memref<32xf32, #tpu.memory_space<vmem>>) target_semaphore(%74 : memref<!tpu.dma_semaphore, #tpu.memory_space<semaphore_mem>>)
    %c0 = arith.constant 0 : index
    %c0_33 = arith.constant 0 : index
    %c0_34 = arith.constant 0 : index
    %75 = vector.load %arg6[%c0, %c0_33, %c0_34] : memref<1x8x2xbf16, #tpu.memory_space<vmem>>, vector<1x8x2xbf16>
    %76 = vector.shape_cast %75 : vector<1x8x2xbf16> to vector<8x2xbf16>
    %c0_35 = arith.constant 0 : index
    %c0_36 = arith.constant 0 : index
    %77 = vector.load %arg5[%c0_35, %c0_36] : memref<2x32xbf16, #tpu.memory_space<vmem>>, vector<2x32xbf16>
    %cst = arith.constant dense<0.000000e+00> : vector<8x32xf32>
    %78 = tpu.matmul %76, %77, %cst {dimension_numbers = #tpu.dot_dimension_numbers<[1], [0], [0], [1], [0, 0, 1, 1], [], []>} : vector<8x2xbf16>, vector<2x32xbf16>, vector<8x32xf32> -> vector<8x32xf32>
    %c0_37 = arith.constant 0 : index
    %c0_38 = arith.constant 0 : index
    %79 = vector.load %arg4[%c0_37, %c0_38] : memref<8x32xbf16, #tpu.memory_space<vmem>>, vector<8x32xbf16>
    %80 = arith.extf %79 : vector<8x32xbf16> to vector<8x32xf32>
    %c0_i32_39 = arith.constant 0 : i32
    %c0_i32_40 = arith.constant 0 : i32
    %c0_i32_41 = arith.constant 0 : i32
    %c0_i32_42 = arith.constant 0 : i32
    %81 = tpu.memref_slice %arg3[%c0_i32_39, %c0_i32_42] : memref<64x32xf32, #tpu.memory_space<any>> -> memref<1x32xf32, #tpu.memory_space<any>>
    %82 = tpu.memref_squeeze %81 : memref<1x32xf32, #tpu.memory_space<any>> -> memref<32xf32, #tpu.memory_space<any>>
    %c0_i32_43 = arith.constant 0 : i32
    %83 = tpu.memref_slice %arg10[%c0_i32_40, %c0_i32_43] : memref<8x32xf32, #tpu.memory_space<vmem>> -> memref<1x32xf32, #tpu.memory_space<vmem>>
    %84 = tpu.memref_squeeze %83 : memref<1x32xf32, #tpu.memory_space<vmem>> -> memref<32xf32, #tpu.memory_space<vmem>>
    %85 = tpu.memref_slice %arg11[%c0_i32_41] : memref<1x!tpu.dma_semaphore, #tpu.memory_space<semaphore_mem>> -> memref<1x!tpu.dma_semaphore, #tpu.memory_space<semaphore_mem>>
    %86 = tpu.memref_squeeze %85 : memref<1x!tpu.dma_semaphore, #tpu.memory_space<semaphore_mem>> -> memref<!tpu.dma_semaphore, #tpu.memory_space<semaphore_mem>>
    tpu.wait_dma2 semaphore(%86 : memref<!tpu.dma_semaphore, #tpu.memory_space<semaphore_mem>>) src(%82 : memref<32xf32, #tpu.memory_space<any>>) dst(%84 : memref<32xf32, #tpu.memory_space<vmem>>)
    %c0_i32_44 = arith.constant 0 : i32
    %c0_i32_45 = arith.constant 0 : i32
    %c0_i32_46 = arith.constant 0 : i32
    %c0_i32_47 = arith.constant 0 : i32
    %87 = tpu.memref_slice %arg3[%c0_i32_44, %c0_i32_47] : memref<64x32xf32, #tpu.memory_space<any>> -> memref<1x32xf32, #tpu.memory_space<any>>
    %88 = tpu.memref_squeeze %87 : memref<1x32xf32, #tpu.memory_space<any>> -> memref<32xf32, #tpu.memory_space<any>>
    %c0_i32_48 = arith.constant 0 : i32
    %89 = tpu.memref_slice %arg10[%c0_i32_45, %c0_i32_48] : memref<8x32xf32, #tpu.memory_space<vmem>> -> memref<1x32xf32, #tpu.memory_space<vmem>>
    %90 = tpu.memref_squeeze %89 : memref<1x32xf32, #tpu.memory_space<vmem>> -> memref<32xf32, #tpu.memory_space<vmem>>
    %91 = tpu.memref_slice %arg11[%c0_i32_46] : memref<1x!tpu.dma_semaphore, #tpu.memory_space<semaphore_mem>> -> memref<1x!tpu.dma_semaphore, #tpu.memory_space<semaphore_mem>>
    %92 = tpu.memref_squeeze %91 : memref<1x!tpu.dma_semaphore, #tpu.memory_space<semaphore_mem>> -> memref<!tpu.dma_semaphore, #tpu.memory_space<semaphore_mem>>
    tpu.wait_dma2 semaphore(%92 : memref<!tpu.dma_semaphore, #tpu.memory_space<semaphore_mem>>) src(%88 : memref<32xf32, #tpu.memory_space<any>>) dst(%90 : memref<32xf32, #tpu.memory_space<vmem>>)
    %c0_i32_49 = arith.constant 0 : i32
    %c0_i32_50 = arith.constant 0 : i32
    %c0_i32_51 = arith.constant 0 : i32
    %c0_i32_52 = arith.constant 0 : i32
    %93 = tpu.memref_slice %arg3[%c0_i32_49, %c0_i32_52] : memref<64x32xf32, #tpu.memory_space<any>> -> memref<1x32xf32, #tpu.memory_space<any>>
    %94 = tpu.memref_squeeze %93 : memref<1x32xf32, #tpu.memory_space<any>> -> memref<32xf32, #tpu.memory_space<any>>
    %c0_i32_53 = arith.constant 0 : i32
    %95 = tpu.memref_slice %arg10[%c0_i32_50, %c0_i32_53] : memref<8x32xf32, #tpu.memory_space<vmem>> -> memref<1x32xf32, #tpu.memory_space<vmem>>
    %96 = tpu.memref_squeeze %95 : memref<1x32xf32, #tpu.memory_space<vmem>> -> memref<32xf32, #tpu.memory_space<vmem>>
    %97 = tpu.memref_slice %arg11[%c0_i32_51] : memref<1x!tpu.dma_semaphore, #tpu.memory_space<semaphore_mem>> -> memref<1x!tpu.dma_semaphore, #tpu.memory_space<semaphore_mem>>
    %98 = tpu.memref_squeeze %97 : memref<1x!tpu.dma_semaphore, #tpu.memory_space<semaphore_mem>> -> memref<!tpu.dma_semaphore, #tpu.memory_space<semaphore_mem>>
    tpu.wait_dma2 semaphore(%98 : memref<!tpu.dma_semaphore, #tpu.memory_space<semaphore_mem>>) src(%94 : memref<32xf32, #tpu.memory_space<any>>) dst(%96 : memref<32xf32, #tpu.memory_space<vmem>>)
    %c0_i32_54 = arith.constant 0 : i32
    %c0_i32_55 = arith.constant 0 : i32
    %c0_i32_56 = arith.constant 0 : i32
    %c0_i32_57 = arith.constant 0 : i32
    %99 = tpu.memref_slice %arg3[%c0_i32_54, %c0_i32_57] : memref<64x32xf32, #tpu.memory_space<any>> -> memref<1x32xf32, #tpu.memory_space<any>>
    %100 = tpu.memref_squeeze %99 : memref<1x32xf32, #tpu.memory_space<any>> -> memref<32xf32, #tpu.memory_space<any>>
    %c0_i32_58 = arith.constant 0 : i32
    %101 = tpu.memref_slice %arg10[%c0_i32_55, %c0_i32_58] : memref<8x32xf32, #tpu.memory_space<vmem>> -> memref<1x32xf32, #tpu.memory_space<vmem>>
    %102 = tpu.memref_squeeze %101 : memref<1x32xf32, #tpu.memory_space<vmem>> -> memref<32xf32, #tpu.memory_space<vmem>>
    %103 = tpu.memref_slice %arg11[%c0_i32_56] : memref<1x!tpu.dma_semaphore, #tpu.memory_space<semaphore_mem>> -> memref<1x!tpu.dma_semaphore, #tpu.memory_space<semaphore_mem>>
    %104 = tpu.memref_squeeze %103 : memref<1x!tpu.dma_semaphore, #tpu.memory_space<semaphore_mem>> -> memref<!tpu.dma_semaphore, #tpu.memory_space<semaphore_mem>>
    tpu.wait_dma2 semaphore(%104 : memref<!tpu.dma_semaphore, #tpu.memory_space<semaphore_mem>>) src(%100 : memref<32xf32, #tpu.memory_space<any>>) dst(%102 : memref<32xf32, #tpu.memory_space<vmem>>)
    %c0_i32_59 = arith.constant 0 : i32
    %c0_i32_60 = arith.constant 0 : i32
    %c0_i32_61 = arith.constant 0 : i32
    %c0_i32_62 = arith.constant 0 : i32
    %105 = tpu.memref_slice %arg3[%c0_i32_59, %c0_i32_62] : memref<64x32xf32, #tpu.memory_space<any>> -> memref<1x32xf32, #tpu.memory_space<any>>
    %106 = tpu.memref_squeeze %105 : memref<1x32xf32, #tpu.memory_space<any>> -> memref<32xf32, #tpu.memory_space<any>>
    %c0_i32_63 = arith.constant 0 : i32
    %107 = tpu.memref_slice %arg10[%c0_i32_60, %c0_i32_63] : memref<8x32xf32, #tpu.memory_space<vmem>> -> memref<1x32xf32, #tpu.memory_space<vmem>>
    %108 = tpu.memref_squeeze %107 : memref<1x32xf32, #tpu.memory_space<vmem>> -> memref<32xf32, #tpu.memory_space<vmem>>
    %109 = tpu.memref_slice %arg11[%c0_i32_61] : memref<1x!tpu.dma_semaphore, #tpu.memory_space<semaphore_mem>> -> memref<1x!tpu.dma_semaphore, #tpu.memory_space<semaphore_mem>>
    %110 = tpu.memref_squeeze %109 : memref<1x!tpu.dma_semaphore, #tpu.memory_space<semaphore_mem>> -> memref<!tpu.dma_semaphore, #tpu.memory_space<semaphore_mem>>
    tpu.wait_dma2 semaphore(%110 : memref<!tpu.dma_semaphore, #tpu.memory_space<semaphore_mem>>) src(%106 : memref<32xf32, #tpu.memory_space<any>>) dst(%108 : memref<32xf32, #tpu.memory_space<vmem>>)
    %c0_i32_64 = arith.constant 0 : i32
    %c0_i32_65 = arith.constant 0 : i32
    %c0_i32_66 = arith.constant 0 : i32
    %c0_i32_67 = arith.constant 0 : i32
    %111 = tpu.memref_slice %arg3[%c0_i32_64, %c0_i32_67] : memref<64x32xf32, #tpu.memory_space<any>> -> memref<1x32xf32, #tpu.memory_space<any>>
    %112 = tpu.memref_squeeze %111 : memref<1x32xf32, #tpu.memory_space<any>> -> memref<32xf32, #tpu.memory_space<any>>
    %c0_i32_68 = arith.constant 0 : i32
    %113 = tpu.memref_slice %arg10[%c0_i32_65, %c0_i32_68] : memref<8x32xf32, #tpu.memory_space<vmem>> -> memref<1x32xf32, #tpu.memory_space<vmem>>
    %114 = tpu.memref_squeeze %113 : memref<1x32xf32, #tpu.memory_space<vmem>> -> memref<32xf32, #tpu.memory_space<vmem>>
    %115 = tpu.memref_slice %arg11[%c0_i32_66] : memref<1x!tpu.dma_semaphore, #tpu.memory_space<semaphore_mem>> -> memref<1x!tpu.dma_semaphore, #tpu.memory_space<semaphore_mem>>
    %116 = tpu.memref_squeeze %115 : memref<1x!tpu.dma_semaphore, #tpu.memory_space<semaphore_mem>> -> memref<!tpu.dma_semaphore, #tpu.memory_space<semaphore_mem>>
    tpu.wait_dma2 semaphore(%116 : memref<!tpu.dma_semaphore, #tpu.memory_space<semaphore_mem>>) src(%112 : memref<32xf32, #tpu.memory_space<any>>) dst(%114 : memref<32xf32, #tpu.memory_space<vmem>>)
    %c0_i32_69 = arith.constant 0 : i32
    %c0_i32_70 = arith.constant 0 : i32
    %c0_i32_71 = arith.constant 0 : i32
    %c0_i32_72 = arith.constant 0 : i32
    %117 = tpu.memref_slice %arg3[%c0_i32_69, %c0_i32_72] : memref<64x32xf32, #tpu.memory_space<any>> -> memref<1x32xf32, #tpu.memory_space<any>>
    %118 = tpu.memref_squeeze %117 : memref<1x32xf32, #tpu.memory_space<any>> -> memref<32xf32, #tpu.memory_space<any>>
    %c0_i32_73 = arith.constant 0 : i32
    %119 = tpu.memref_slice %arg10[%c0_i32_70, %c0_i32_73] : memref<8x32xf32, #tpu.memory_space<vmem>> -> memref<1x32xf32, #tpu.memory_space<vmem>>
    %120 = tpu.memref_squeeze %119 : memref<1x32xf32, #tpu.memory_space<vmem>> -> memref<32xf32, #tpu.memory_space<vmem>>
    %121 = tpu.memref_slice %arg11[%c0_i32_71] : memref<1x!tpu.dma_semaphore, #tpu.memory_space<semaphore_mem>> -> memref<1x!tpu.dma_semaphore, #tpu.memory_space<semaphore_mem>>
    %122 = tpu.memref_squeeze %121 : memref<1x!tpu.dma_semaphore, #tpu.memory_space<semaphore_mem>> -> memref<!tpu.dma_semaphore, #tpu.memory_space<semaphore_mem>>
    tpu.wait_dma2 semaphore(%122 : memref<!tpu.dma_semaphore, #tpu.memory_space<semaphore_mem>>) src(%118 : memref<32xf32, #tpu.memory_space<any>>) dst(%120 : memref<32xf32, #tpu.memory_space<vmem>>)
    %c0_i32_74 = arith.constant 0 : i32
    %c0_i32_75 = arith.constant 0 : i32
    %c0_i32_76 = arith.constant 0 : i32
    %c0_i32_77 = arith.constant 0 : i32
    %123 = tpu.memref_slice %arg3[%c0_i32_74, %c0_i32_77] : memref<64x32xf32, #tpu.memory_space<any>> -> memref<1x32xf32, #tpu.memory_space<any>>
    %124 = tpu.memref_squeeze %123 : memref<1x32xf32, #tpu.memory_space<any>> -> memref<32xf32, #tpu.memory_space<any>>
    %c0_i32_78 = arith.constant 0 : i32
    %125 = tpu.memref_slice %arg10[%c0_i32_75, %c0_i32_78] : memref<8x32xf32, #tpu.memory_space<vmem>> -> memref<1x32xf32, #tpu.memory_space<vmem>>
    %126 = tpu.memref_squeeze %125 : memref<1x32xf32, #tpu.memory_space<vmem>> -> memref<32xf32, #tpu.memory_space<vmem>>
    %127 = tpu.memref_slice %arg11[%c0_i32_76] : memref<1x!tpu.dma_semaphore, #tpu.memory_space<semaphore_mem>> -> memref<1x!tpu.dma_semaphore, #tpu.memory_space<semaphore_mem>>
    %128 = tpu.memref_squeeze %127 : memref<1x!tpu.dma_semaphore, #tpu.memory_space<semaphore_mem>> -> memref<!tpu.dma_semaphore, #tpu.memory_space<semaphore_mem>>
    tpu.wait_dma2 semaphore(%128 : memref<!tpu.dma_semaphore, #tpu.memory_space<semaphore_mem>>) src(%124 : memref<32xf32, #tpu.memory_space<any>>) dst(%126 : memref<32xf32, #tpu.memory_space<vmem>>)
    %c0_79 = arith.constant 0 : index
    %c0_80 = arith.constant 0 : index
    %129 = vector.load %arg10[%c0_79, %c0_80] : memref<8x32xf32, #tpu.memory_space<vmem>>, vector<8x32xf32>
    %130 = arith.addf %129, %80 : vector<8x32xf32>
    %131 = arith.addf %130, %78 : vector<8x32xf32>
    %cst_81 = arith.constant dense<0.000000e+00> : vector<8xf32>
    %132 = vector.multi_reduction <add>, %131, %cst_81 [1] : vector<8x32xf32> to vector<8xf32>
    %133 = vector.shape_cast %132 : vector<8xf32> to vector<8x1xf32>
    %cst_82 = arith.constant 3.200000e+01 : f32
    %134 = vector.broadcast %cst_82 : f32 to vector<8x1xf32>
    %135 = arith.divf %133, %134 : vector<8x1xf32>
    %136 = vector.broadcast %135 : vector<8x1xf32> to vector<8x32xf32>
    %137 = arith.subf %131, %136 : vector<8x32xf32>
    %138 = arith.mulf %137, %137 : vector<8x32xf32>
    %cst_83 = arith.constant dense<0.000000e+00> : vector<8xf32>
    %139 = vector.multi_reduction <add>, %138, %cst_83 [1] : vector<8x32xf32> to vector<8xf32>
    %140 = vector.shape_cast %139 : vector<8xf32> to vector<8x1xf32>
    %cst_84 = arith.constant 3.200000e+01 : f32
    %141 = vector.broadcast %cst_84 : f32 to vector<8x1xf32>
    %142 = arith.divf %140, %141 : vector<8x1xf32>
    %143 = vector.broadcast %135 : vector<8x1xf32> to vector<8x32xf32>
    %144 = arith.subf %131, %143 : vector<8x32xf32>
    %cst_85 = arith.constant 9.99999996E-13 : f32
    %145 = vector.broadcast %cst_85 : f32 to vector<8x1xf32>
    %146 = arith.addf %142, %145 : vector<8x1xf32>
    %147 = math.rsqrt %146 : vector<8x1xf32>
    %148 = vector.broadcast %147 : vector<8x1xf32> to vector<8x32xf32>
    %149 = arith.mulf %144, %148 : vector<8x32xf32>
    %c0_86 = arith.constant 0 : index
    %c0_87 = arith.constant 0 : index
    %150 = vector.load %arg7[%c0_86, %c0_87] : memref<1x32xf32, #tpu.memory_space<vmem>>, vector<1x32xf32>
    %151 = vector.broadcast %150 : vector<1x32xf32> to vector<8x32xf32>
    %152 = arith.mulf %149, %151 : vector<8x32xf32>
    %c0_88 = arith.constant 0 : index
    %c0_89 = arith.constant 0 : index
    %153 = vector.load %arg8[%c0_88, %c0_89] : memref<1x32xf32, #tpu.memory_space<vmem>>, vector<1x32xf32>
    %154 = vector.broadcast %153 : vector<1x32xf32> to vector<8x32xf32>
    %155 = arith.addf %152, %154 : vector<8x32xf32>
    %156 = vector.shape_cast %155 : vector<8x32xf32> to vector<1x8x32xf32>
    %c0_90 = arith.constant 0 : index
    %c0_91 = arith.constant 0 : index
    %c0_92 = arith.constant 0 : index
    %157 = vector.load %arg9[%c0_90, %c0_91, %c0_92] : memref<1x8x32xf32, #tpu.memory_space<vmem>>, vector<1x8x32xf32>
    tpu.vector_store %arg9[%c0_90, %c0_91, %c0_92], %156 {strides = array<i32>} : memref<1x8x32xf32, #tpu.memory_space<vmem>>, vector<1x8x32xf32>,
    return
  }
  func.func @transform_1(%arg0: i32, %arg1: i32, %arg2: memref<16xi32, #tpu.memory_space<smem>>) -> (i32, i32) {
    %c0_i32 = arith.constant 0 : i32
    %c0_i32_0 = arith.constant 0 : i32
    return %arg1, %c0_i32 : i32, i32
  }
  func.func @transform_2(%arg0: i32, %arg1: i32, %arg2: memref<16xi32, #tpu.memory_space<smem>>) -> (i32, i32) {
    %c0_i32 = arith.constant 0 : i32
    %c0_i32_0 = arith.constant 0 : i32
    %c0_i32_1 = arith.constant 0 : i32
    return %c0_i32, %c0_i32_0 : i32, i32
  }
  func.func @transform_3(%arg0: i32, %arg1: i32, %arg2: memref<16xi32, #tpu.memory_space<smem>>) -> (i32, i32, i32) {
    %c0_i32 = arith.constant 0 : i32
    %c0_i32_0 = arith.constant 0 : i32
    return %arg0, %arg1, %c0_i32 : i32, i32, i32
  }
  func.func @transform_4(%arg0: i32, %arg1: i32, %arg2: memref<16xi32, #tpu.memory_space<smem>>) -> (i32, i32) {
    %c0_i32 = arith.constant 0 : i32
    %c0_i32_0 = arith.constant 0 : i32
    %c0_i32_1 = arith.constant 0 : i32
    return %c0_i32, %c0_i32_0 : i32, i32
  }
  func.func @transform_5(%arg0: i32, %arg1: i32, %arg2: memref<16xi32, #tpu.memory_space<smem>>) -> (i32, i32) {
    %c0_i32 = arith.constant 0 : i32
    %c0_i32_0 = arith.constant 0 : i32
    %c0_i32_1 = arith.constant 0 : i32
    return %c0_i32, %c0_i32_0 : i32, i32
  }
  func.func @transform_6(%arg0: i32, %arg1: i32, %arg2: memref<16xi32, #tpu.memory_space<smem>>) -> (i32, i32, i32) {
    %c0_i32 = arith.constant 0 : i32
    %c0_i32_0 = arith.constant 0 : i32
    return %arg0, %arg1, %c0_i32 : i32, i32, i32
  }
}

</mosaic_0001>

<bundles_post_ra>
// kernel: tpu_custom_call.1
= control target key start
LH: loop header
LB: loop body
LE: loop exit
PB: predicated region body
PF: predicated region fallthrough
CT: control target
= control target key end

     0   :  { %s1365_s0 = inlined_call_operand.vmem [shape: s32[16], index: 0, kind: input, shape index: {}]   ;;  %s1366_s1 = inlined_call_operand.vmem [shape: f32[64,32], index: 1, kind: input, shape index: {}]   ;;  %s1367_s2 = inlined_call_operand.vmem [shape: bf16[64,32], index: 2, kind: input, shape index: {}]   ;;  %s1368_s3 = inlined_call_operand.vmem [shape: bf16[2,32], index: 3, kind: input, shape index: {}]   ;;  %s1369_s4 = inlined_call_operand.vmem [shape: bf16[2,8,2], index: 4, kind: input, shape index: {}]   ;;  %s1370_s5 = inlined_call_operand.vmem [shape: f32[1,32], index: 5, kind: input, shape index: {}]   ;;  %s1371_s6 = inlined_call_operand.vmem [shape: f32[1,32], index: 6, kind: input, shape index: {}]   ;;  %s1372_s7 = inlined_call_operand.hbm [shape: f32[2,8,32], index: 7, kind: output, shape index: {}]  }
   0x1   :  { %s12_s26 = sshll.u32 %s1365_s0, 4  ;;  %s13_s26 = int_to_ptr.vmem [resolvable:$true] %s12_s26 }
   0x2   :  { %s1046_s27 = scalar_lea.vmem %s13_s26, 16  ;;  %p1051_p1 = scmp.lt.s32.totalorder %s13_s26, %s13_s26 }
   0x3   :  { %p1047_p0 = scmp.ne.s32.totalorder %s13_s26, %s1046_s27  ;;  %p1052_p2 = scmp.lt.s32.totalorder %s1046_s27, %s1046_s27 }
   0x5   :  { %p1053_p3 = por %p1052_p2, %p1051_p1 }
   0x7   :  { %p1054_p4 = pnand %p1053_p3, %p1047_p0 }
   0x9   :  { %1057 = shalt.err (!%p1054_p4)  }
   0xa   :  { %s1142_s28 = smov [#allocation5]  }
   0xb   :  { %15 = dma.vmem_to_smem %s13_s26, 16, %s1142_s28, [#allocation4] }
   0xc   :  { %1110 = dma.done.wait [#allocation4], 16 }
   0xd   :  { %1111 = vsyncadd [#allocation4], 4294967280 }
   0xe   :  { %17 = sfence }
   0xf   :  { %18 = vsyncpa [#allocation7], 0 }
  0x10   :  { %20 = vsyncpa [#allocation7 + $0x1], 0  ;;  %s1189_s29 = smov 0   ;;  %s1191_s30 = smov 0  }
  0x11   :  { %s1193_s0 = smov 0   ;;  %s1195_s8 = smov 0  }
  0x12   :  { %s1197_s9 = smov 0   ;;  %s1199_s10 = smov 0  }
  0x13 LB: > { %1376 = sst [smem:[#allocation19_spill]] %s1136_s9  ;;  %s961_s11 = sadd.s32 4294967295, %s1140_s10   ;;  %s1140_s10 = sphi %s1199_s10, %s26_s10   ;;  %s1136_s9 = sphi %s1197_s9, %s1384_s9   ;;  %s1132_s8 = sphi %s1195_s8, %s1383_s8   ;;  %s1128_s0 = sphi %s1193_s0, %s1387_s0   ;;  %s1124_s30 = sphi %s1191_s30, %s1386_s30   ;;  %s1120_s29 = sphi %s1189_s29, %s1385_s29  }
  0x14   : > { %s962_s12 = sadd.s32 4294967294, %s1140_s10   ;;  %s38_s13 = sadd.s32 1, %s1136_s9 }
  0x15   : > { %s164_s14 = sadd.s32 1, %s1128_s0  ;;  %p40_p5 = scmp.ge.s32.totalorder %s38_s13, 2 }
  0x16   : > { %p174_p6 = scmp.ne.s32.totalorder %s1128_s0, %s1124_s30  ;;  %p175_p7 = scmp.eq.s32.totalorder %s961_s11, 1 }
  0x17   : > { %p180_p8 = scmp.ne.s32.totalorder %s1124_s30, %s1120_s29  ;;  %s1389_s13 = smov (%p40_p5, %s38_s13), 0 }
  0x18   : > { %1377 = sst [smem:[#allocation20_spill]] %s1389_s13  ;;  %p1229_p9 = por %p175_p7, %p174_p6 }
  0x19   : > { %p181_p10 = scmp.eq.s32.totalorder %s962_s12, 1  ;;  %s159_s16 = ssub.s32 %s1136_s9, %s1389_s13 }
  0x1a   : > { %p966_p11 = scmp.ge.s32.totalorder %s1140_s10, 1  ;;  %p162_p12 = scmp.eq.s32.totalorder %s159_s16, 0 }
  0x1b   : > { %p1236_p13 = por %p181_p10, %p180_p8  ;;  %p225_p0 = scmp.lt.s32.totalorder %s1140_s10, 3 }
  0x1c   : > { %s1242_s18 = scalar_select %p162_p12, %s1128_s0, %s164_s14  }
  0x1d   : > { %p226_p1 = pnand %p966_p11, %p225_p0 }
  0x1e   : > { %s1373_s19 = sand.u32 (!%p226_p1), 1, %s1124_s30   ;;  %p263_p2 = scmp.lt.s32.totalorder (!%p226_p1), %s1132_s8, 1 }
  0x1f   : > { %229 = sbr.rel (%p226_p1) target bundleno = 665 (0x299), region = 40  ;;  %s1248_s20 = sshll.u32 (!%p226_p1), %s1373_s19, 3 }
  0x20   : > { %s1251_s21 = sshll.u32 (!%p226_p1), %s1132_s8, 3 }
  0x21   : > { %s274_s22 = sld [smem:[#allocation5 + %s1251_s21]] (!%p226_p1) }
  0x26   : > { %s264_s23 = scalar_select %p263_p2, %s1132_s8, 1 }
  0x27   : > { %s275_s12 = scalar_lea.vmem %s1366_s1, %s274_s22 }
  0x28   : > { %s968_s24 = sshll.u32 %s264_s23, 2  ;;  %v293_v0 = vld [vmem:[%s275_s12] sm:$0x1] }
  0x29   : > { %s1258_s27 = scalar_lea.vmem %s1369_s4, %s968_s24  ;;  %294 = vst [vmem:[#allocation2] sm:$0x1] %v293_v0 }
  0x2a   : > { %319 = vsyncadd [#allocation3], 16  ;;  %s320_s16 = sadd.s32 1, %s1251_s21 }
  0x2b   : > { %s321_s19 = sld [smem:[#allocation5 + %s320_s16]] }
  0x31   : > { %s322_s23 = scalar_lea.vmem %s1366_s1, %s321_s19 }
  0x32   : > { %v341_v1 = vld [vmem:[%s322_s23] sm:$0x1] }
  0x33   : > { %342 = vst [vmem:[#allocation2 + $0x1] sm:$0x1] %v341_v1 }
  0x34   : > { %367 = vsyncadd [#allocation3], 16  ;;  %s368_s24 = sadd.s32 2, %s1251_s21 }
  0x35   : > { %s369_s25 = sld [smem:[#allocation5 + %s368_s24]] }
  0x3b   : > { %s370_s22 = scalar_lea.vmem %s1366_s1, %s369_s25 }
  0x3c   : > { %v389_v2 = vld [vmem:[%s370_s22] sm:$0x1] }
  0x3d   : > { %390 = vst [vmem:[#allocation2 + $0x2] sm:$0x1] %v389_v2 }
  0x3e   : > { %415 = vsyncadd [#allocation3], 16  ;;  %s416_s11 = sadd.s32 3, %s1251_s21 }
  0x3f   : > { %s417_s12 = sld [smem:[#allocation5 + %s416_s11]] }
  0x45   : > { %s418_s9 = scalar_lea.vmem %s1366_s1, %s417_s12 }
  0x46   : > { %v437_v3 = vld [vmem:[%s418_s9] sm:$0x1] }
  0x47   : > { %438 = vst [vmem:[#allocation2 + $0x3] sm:$0x1] %v437_v3 }
  0x48   : > { %463 = vsyncadd [#allocation3], 16  ;;  %s464_s13 = sadd.s32 4, %s1251_s21 }
  0x49   : > { %s465_s19 = sld [smem:[#allocation5 + %s464_s13]] }
  0x4f   : > { %s466_s25 = scalar_lea.vmem %s1366_s1, %s465_s19 }
  0x50   : > { %v485_v4 = vld [vmem:[%s466_s25] sm:$0x1] }
  0x51   : > { %486 = vst [vmem:[#allocation2 + $0x4] sm:$0x1] %v485_v4 }
  0x52   : > { %511 = vsyncadd [#allocation3], 16  ;;  %s512_s26 = sadd.s32 5, %s1251_s21 }
  0x53   : > { %s513_s28 = sld [smem:[#allocation5 + %s512_s26]] }
  0x59   : > { %s514_s14 = scalar_lea.vmem %s1366_s1, %s513_s28 }
  0x5a   : > { %v533_v5 = vld [vmem:[%s514_s14] sm:$0x1] }
  0x5b   : > { %534 = vst [vmem:[#allocation2 + $0x5] sm:$0x1] %v533_v5 }
  0x5c   : > { %559 = vsyncadd [#allocation3], 16  ;;  %s560_s12 = sadd.s32 6, %s1251_s21 }
  0x5d   : > { %s561_s16 = sld [smem:[#allocation5 + %s560_s12]] }
  0x63   : > { %s562_s19 = scalar_lea.vmem %s1366_s1, %s561_s16 }
  0x64   : > { %v581_v6 = vld [vmem:[%s562_s19] sm:$0x1] }
  0x65   : > { %582 = vst [vmem:[#allocation2 + $0x6] sm:$0x1] %v581_v6 }
  0x66   : > { %607 = vsyncadd [#allocation3], 16  ;;  %s608_s23 = sadd.s32 7, %s1251_s21 }
  0x67   : > { %s609_s24 = sld [smem:[#allocation5 + %s608_s23]] }
  0x6d   : > { %s610_s28 = scalar_lea.vmem %s1366_s1, %s609_s24 }
  0x6e   : > { %v629_v7 = vld [vmem:[%s610_s28] sm:$0x1] }
  0x6f   : > { %630 = vst [vmem:[#allocation2 + $0x7] sm:$0x1] %v629_v7 }
  0x70   : > { %655 = vsyncadd [#allocation3], 16  ;;  %v657_v8 = vld [vmem:[%s1368_s3] sm:$0x1]  ;;  %vm662_vm0 = vcmask 1040384   ;;  %v1143_v9 = vmov 0.0  }
  0x71   : > { %980 = vmatprep.subr.bf16.mxu0 %v1143_v9  ;;  %v664_v10 = vsel %vm662_vm0, %v657_v8, 0  ;;  %vm1144_vm1 = vmmov 0   ;;  %v656_v11 = vld [vmem:[%s1258_s27] sm:$0xf]  ;;  %vm658_vm2 = vcmask 15360  }
  0x72   : > { %981 = vmatpush3.bf16.msra.mxu0 %v664_v10  ;;  %982 = vmatprep.mubr.msk.bf16.mxu0 %vm1144_vm1, %v1143_v9  ;;  %v706_v12 = vld [vmem:[%s1367_s2] sm:$0xf] }
  0x73   : > { %v707_v13 = vunpack.c.l.bf16 %v706_v12 }
  0x75   : > { %983 = vmatmul.mubr.msk.bf16.vlgmr.msra.gmra.mrb[0].mxu0 %vm658_vm2, %v656_v11 }
 0x148   : > { %v700_v14 = vpop.f32.mrb[0].mxu0 }
 0x149   : > { %v984_v15 = vpop.f32.mrb[1].mxu0 }
 0x14a   : > { %v703_v16 = vpop.f32.mrb[2].mxu0 }
 0x14b   : > { %v985_v17 = vpop.f32.mrb[3].mxu0 }
 0x14c   : > { %1112 = dma.done.wait [#allocation3], 128 }
 0x14d   : > { %1113 = vsyncadd [#allocation3], 4294967168  ;;  %v724_v18 = vld [vmem:[#allocation2] sm:$0xff]  ;;  %vm727_vm3 = vcmask 261120   ;;  %s974_s13 = sshll.u32 %s1132_s8, 7  ;;  %s1380_s19 = scalar_lea.vmem [#allocation6], %s1248_s20 }
 0x14e   : > { %v725_v19 = vadd.f32 %v724_v18, %v707_v13  ;;  %v971_v31 = vld [vmem:[%s1370_s5] ss:$0 sm:$0xff]  ;;  %s774_s23 = sshll.u32 %s1380_s19, 4  ;;  %s1313_s26 = scalar_lea.hbm %s1372_s7, %s974_s13  ;;  %s1315_s23 = int_to_ptr.vmem [resolvable:$true] %s774_s23 }
 0x14f   : > { %v972_v33 = vld [vmem:[%s1371_s6] ss:$0 sm:$0xff]  ;;  %s1381_s28 = smov %s1380_s19  ;;  %s1382_s22 = sand.u32 1, %s1124_s30  }
 0x150   : > { %v726_v20 = vadd.f32 %v725_v19, %v700_v14  ;;  %s760_s11 = scalar_lea.sflag [#allocation7], %s1382_s22  ;;  %s1058_s8 = scalar_lea.vmem %s1315_s23, 128 }
 0x151   : > { %p1059_p3 = scmp.ne.s32.totalorder %s1315_s23, %s1058_s8  ;;  %s1145_s21 = smov [#allocation6]  }
 0x152   : > { %v728_v21 = vsel %vm727_vm3, %v726_v20, 0.0  ;;  %s1062_s14 = sshll.u32 %s1145_s21, 4  ;;  %s1063_s14 = int_to_ptr.vmem [resolvable:$false] %s1062_s14 }
 0x153   : > { %729 = vadd.xlane.f32.xlu0 %v728_v21  ;;  %p1060_p4 = pnand %p1059_p3, %p1229_p9  ;;  %s1064_s27 = scalar_lea.vmem %s1063_s14, 256 }
 0x154   : > { %p1065_p6 = scmp.lt.s32.totalorder %s1315_s23, %s1063_s14  ;;  %p1066_p7 = scmp.lt.s32.totalorder %s1064_s27, %s1058_s8 }
 0x155   : > { %p1061_p5 = pneg %p1060_p4 }
 0x156   : > { %p1067_p8 = por %p1066_p7, %p1065_p6 }
 0x158   : > { %p1068_p10 = pnand %p1067_p8, %p1061_p5 }
 0x1e0   : > { %v730_v22 = vpop.xlane.xlu0 %729 }
 0x1e1   : > { %v732_v23 = vmul.f32 0.03125, %v730_v22 }
 0x1e3   : > { %v733_v24 = vsub.f32 %v726_v20, %v732_v23 }
 0x1e5   : > { %v734_v25 = vmul.f32 %v733_v24, %v733_v24 }
 0x1e7   : > { %v735_v26 = vsel %vm727_vm3, %v734_v25, 0.0 }
 0x1e8   : > { %736 = vadd.xlane.f32.xlu0 %v735_v26 }
 0x275   : > { %v737_v27 = vpop.xlane.xlu0 %736 }
 0x276   : > { %v738_v28 = vmul.f32 0.03125, %v737_v27 }
 0x278   : > { %v739_v29 = vadd.f32 1e-12, %v738_v28 }
 0x27a   : > { %1044 = vrsqrt.f32 %v739_v29 }
 0x284   : > { %v1045_v30 = vpop.eup %1044 }
 0x285   : > { %v741_v32 = vmul.f32 %v1045_v30, %v733_v24 }
 0x287   : > { %v749_v34 = vmul.f32 %v971_v31, %v741_v32 }
 0x289   : > { %v757_v35 = vadd.f32 %v972_v33, %v749_v34 }
 0x28b   : > { %758 = vst.msk [vmem:[%s1381_s28] sm:$0xff] %vm727_vm3, %v757_v35 }
 0x28c   : > { %1071 = shalt.err (!%p1068_p10)
}
 0x28d   : > { %s1072_s20 = scalar_lea.hbm %s1313_s26, 128  ;;  %s1076_s9 = scalar_lea.hbm %s1372_s7, 256 }
 0x28e   : > { %p1073_p11 = scmp.ne.s32.totalorder %s1313_s26, %s1072_s20  ;;  %p1077_p1 = scmp.lt.u32.totalorder %s1313_s26, %s1372_s7 }
 0x28f   : > { %p1078_p2 = scmp.lt.u32.totalorder %s1076_s9, %s1072_s20  ;;  %p1080_p4 = scmp.lt.u32.totalorder %s1072_s20, %s1313_s26 }
 0x290   : > { %p1074_p12 = pnand %p1073_p11, %p1229_p9 }
 0x291   : > { %p1079_p3 = por %p1078_p2, %p1077_p1 }
 0x292   : > { %p1075_p0 = pneg %p1074_p12 }
 0x293   : > { %p1081_p5 = por %p1080_p4, %p1079_p3 }
 0x295   : > { %p1082_p6 = pnand %p1081_p5, %p1075_p0 }
 0x297   : > { %1085 = shalt.err (!%p1082_p6)
}
 0x298   : > { %986 = dma.vmem_to_hbm [thread:$0]  (%p1229_p9), %s1315_s23, 128, %s1313_s26, %s760_s11  }
 0x299 PF: > { %p992_p7 = scmp.ge.s32.totalorder %s1140_s10, 2  ;;  %s786_s24 = sand.u32 1, %s1120_s29  }
 0x29a   : > { %s787_s25 = scalar_lea.sflag [#allocation7], %s786_s24 }
 0x29b   : > { %p989_p8 = pnand %p992_p7, %p1236_p13 }
 0x29d   : > { %1115 = dma.done.wait (!%p989_p8), %s787_s25, 128  }
 0x29e   : > { %1117 = vsyncadd (!%p989_p8), %s787_s25, 4294967168  ;;  %s26_s10 = sadd.s32 1, %s1140_s10   ;;  %s1383_s8 = sld [smem:[#allocation19_spill]] }
 0x29f   : > { %p23_p10 = scmp.ge.s32.totalorder %s26_s10, 4   ;;  %s1384_s9 = sld [smem:[#allocation20_spill]] }
 0x2a0   : > { %s1385_s29 = smov %s1124_s30  ;;  %s1386_s30 = smov %s1128_s0 }
 0x2a1   : > { %s1387_s0 = smov %s1242_s18  ;;  %25 = sbr.rel (!%p23_p10) target bundleno = 19 (0x13), region = 413 }
 0x2a8   :  { %792 = vsyncpa [#allocation7], 1 }
 0x2a9   :  { %794 = vsyncpa [#allocation7 + $0x1], 1 }
 0x2aa   :  { %795 = vsyncmov [#allocation3] }
 0x2ad   :  { %s796_s15 = vpop.sfrf %795 }
 0x2ae   :  { %p977_p9 = scmp.ne.s32.totalorder %s796_s15, 0 }
 0x2b0   :  { %800 = shalt.err (%p977_p9)  }

</bundles_post_ra>
